<compile_context>
chip_gen: v5e
topology: v5e:2x2
jax: 0.10.0
libtpu: 0.0.40
codegen_flags: <defaults>
</compile_context>

<pallas_src>
import jax
import jax.numpy as jnp
from jax.experimental import pallas as pl
from jax.experimental.pallas import tpu as pltpu


def _round_up(x, m):
    return ((x + m - 1) // m) * m


def _mlp_kernel(x_ref, w1_ref, b1_ref, w2_ref, b2_ref, w3_ref, b3_ref, o_ref):
    # All matmuls + ReLUs fused; MXU accumulation in f32, elementwise in f32.
    cdt = w1_ref.dtype  # MXU input dtype (bf16 by default, f32 optional)
    x = x_ref[...]
    h1 = jnp.dot(x, w1_ref[...], preferred_element_type=jnp.float32) + b1_ref[...]
    h1 = jnp.maximum(h1, 0.0).astype(cdt)           # ReLU in f32, cast only for MXU
    h2 = jnp.dot(h1, w2_ref[...], preferred_element_type=jnp.float32) + b2_ref[...]
    h2 = jnp.maximum(h2, 0.0).astype(cdt)
    o_ref[...] = (
        jnp.dot(h2, w3_ref[...], preferred_element_type=jnp.float32) + b3_ref[...]
    ).astype(o_ref.dtype)


def linear_network_forward(x, params, *, bm=256, use_bf16=True):
    """Fused forward pass of LinearNetwork.

    x: [B, input_size] float32
    params: dict with w1 [in,64], b1 [1,64], w2 [64,256], b2 [1,256],
            w3 [256,A], b3 [1,A]   (weights stored pre-transposed: y = x @ W + b)
    returns: [B, A] float32
    """
    w1, b1, w2, b2, w3, b3 = (
        params["w1"], params["b1"], params["w2"],
        params["b2"], params["w3"], params["b3"],
    )
    B, in_dim = x.shape
    A = w3.shape[1]

    # --- lane-dense padding (zeros => bit-identical after slicing) -----------
    H1P = 128                      # hidden1: 64 -> 128 lanes
    AP = _round_up(A, 128)         # output:  A  -> multiple of 128 lanes
    w1p = jnp.pad(w1, ((0, 0), (0, H1P - w1.shape[1])))
    b1p = jnp.pad(b1, ((0, 0), (0, H1P - b1.shape[1])))
    w2p = jnp.pad(w2, ((0, H1P - w2.shape[0]), (0, 0)))
    w3p = jnp.pad(w3, ((0, 0), (0, AP - A)))
    b3p = jnp.pad(b3, ((0, 0), (0, AP - A)))

    # --- dtype prep: bf16 MXU operands, f32 biases/accumulation --------------
    mxu_dtype = jnp.bfloat16 if use_bf16 else jnp.float32
    xk = x.astype(mxu_dtype)
    w1k = w1p.astype(mxu_dtype)
    w2k = w2p.astype(mxu_dtype)
    w3k = w3p.astype(mxu_dtype)
    b1k = b1p.astype(jnp.float32)
    b2k = b2.astype(jnp.float32)
    b3k = b3p.astype(jnp.float32)

    # --- batch padding so any B runs the large tile --------------------------
    if use_bf16:
        bm = _round_up(bm, 16)     # bf16 sublane packing
    else:
        bm = _round_up(bm, 8)
    Bp = _round_up(B, bm)
    if Bp != B:
        xk = jnp.pad(xk, ((0, Bp - B), (0, 0)))

    grid = (Bp // bm,)
    # Weights/biases are tiny: constant index_map keeps them VMEM-resident.
    full = lambda shape: pl.BlockSpec(shape, lambda i: (0, 0))

    w_bytes = sum(a.size * a.dtype.itemsize
                  for a in (w1k, b1k, w2k, b2k, w3k, b3k))
    cost = pl.CostEstimate(
        flops=2 * Bp * (in_dim * H1P + H1P * 256 + 256 * AP),
        transcendentals=0,
        bytes_accessed=xk.size * xk.dtype.itemsize + w_bytes + Bp * AP * 4,
    )

    out_p = pl.pallas_call(
        _mlp_kernel,
        out_shape=jax.ShapeDtypeStruct((Bp, AP), jnp.float32),
        grid_spec=pltpu.PrefetchScalarGridSpec(
            num_scalar_prefetch=0,
            grid=grid,
            in_specs=[
                pl.BlockSpec((bm, in_dim), lambda i: (i, 0)),   # x tile (streams)
                full(w1k.shape), full(b1k.shape),
                full(w2k.shape), full(b2k.shape),
                full(w3k.shape), full(b3k.shape),
            ],
            out_specs=pl.BlockSpec((bm, AP), lambda i: (i, 0)),  # lane-dense store
        ),
        compiler_params=pltpu.CompilerParams(
            dimension_semantics=("parallel",),
        ),
        cost_estimate=cost,
    )(xk, w1k, b1k, w2k, b2k, w3k, b3k)

    return out_p[:B, :A]


def init_params(key, input_size, num_actions):
    """Deterministic synthetic parameters matching nn.Linear shapes.

    PyTorch nn.Linear(in, out) has weight [out, in]; we store its transpose
    [in, out] so the kernel does x @ W. Biases stored as [1, out].
    """
    ks = jax.random.split(key, 6)

    def linear(kw, kb, fan_in, fan_out):
        bound = 1.0 / jnp.sqrt(fan_in)
        w = jax.random.uniform(kw, (fan_in, fan_out), jnp.float32, -bound, bound)
        b = jax.random.uniform(kb, (1, fan_out), jnp.float32, -bound, bound)
        return w, b

    w1, b1 = linear(ks[0], ks[1], input_size, 64)
    w2, b2 = linear(ks[2], ks[3], 64, 256)
    w3, b3 = linear(ks[4], ks[5], 256, num_actions)
    return {"w1": w1, "b1": b1, "w2": w2, "b2": b2, "w3": w3, "b3": b3}


def _reference(x, params, use_bf16=True):
    """Pure-JAX reference matching the kernel's math (bf16 MXU operands, f32 acc)."""
    dt = jnp.bfloat16 if use_bf16 else jnp.float32
    h = jnp.dot(x.astype(dt), params["w1"].astype(dt),
                preferred_element_type=jnp.float32) + params["b1"]
    h = jnp.maximum(h, 0.0).astype(dt)
    h = jnp.dot(h, params["w2"].astype(dt),
                preferred_element_type=jnp.float32) + params["b2"]
    h = jnp.maximum(h, 0.0).astype(dt)
    return jnp.dot(h, params["w3"].astype(dt),
                   preferred_element_type=jnp.float32) + params["b3"]


if __name__ == "__main__":
    key = jax.random.PRNGKey(0)
    kx, kp = jax.random.split(key)

    batch = 8
    input_size = 32
    num_actions = 8

    x = jax.random.normal(kx, (batch, input_size), jnp.float32)
    params = init_params(kp, input_size, num_actions)

    out = linear_network_forward(x, params)
    out = jax.block_until_ready(out)

    ref = _reference(x, params, use_bf16=True)
    assert out.shape == (batch, num_actions)
    assert jnp.allclose(out, ref, atol=1e-3, rtol=1e-3)

    # Sanity check against full-f32 math (looser tolerance due to bf16 MXU inputs).
    ref_f32 = _reference(x, params, use_bf16=False)
    assert jnp.allclose(out, ref_f32, atol=5e-2, rtol=5e-2)

    print("KERNEL_OK")
</pallas_src>

<mosaic_0001>
module attributes {stable_mosaic.version = 11 : i64} {
  func.func @_mlp_kernel(%arg0: i32, %arg1: memref<256x32xbf16, #tpu.memory_space<vmem>>, %arg2: memref<32x128xbf16, #tpu.memory_space<vmem>>, %arg3: memref<1x128xf32, #tpu.memory_space<vmem>>, %arg4: memref<128x256xbf16, #tpu.memory_space<vmem>>, %arg5: memref<1x256xf32, #tpu.memory_space<vmem>>, %arg6: memref<256x128xbf16, #tpu.memory_space<vmem>>, %arg7: memref<1x128xf32, #tpu.memory_space<vmem>>, %arg8: memref<256x128xf32, #tpu.memory_space<vmem>>) attributes {dimension_semantics = [#tpu.dimension_semantics<parallel>], iteration_bounds = array<i64: 1>, scalar_prefetch = 0 : i64, scratch_operands = 0 : i64, tpu.core_type = #tpu.core_type<tc>, window_params = [{transform_indices = @transform_0, window_bounds = array<i64: 256, 32>}, {pipeline_mode = #tpu.pipeline_mode<synchronous>, transform_indices = @transform_1, window_bounds = array<i64: 32, 128>}, {pipeline_mode = #tpu.pipeline_mode<synchronous>, transform_indices = @transform_2, window_bounds = array<i64: 1, 128>}, {pipeline_mode = #tpu.pipeline_mode<synchronous>, transform_indices = @transform_3, window_bounds = array<i64: 128, 256>}, {pipeline_mode = #tpu.pipeline_mode<synchronous>, transform_indices = @transform_4, window_bounds = array<i64: 1, 256>}, {pipeline_mode = #tpu.pipeline_mode<synchronous>, transform_indices = @transform_5, window_bounds = array<i64: 256, 128>}, {pipeline_mode = #tpu.pipeline_mode<synchronous>, transform_indices = @transform_6, window_bounds = array<i64: 1, 128>}, {transform_indices = @transform_7, window_bounds = array<i64: 256, 128>}]} {
    %c0 = arith.constant 0 : index
    %c0_0 = arith.constant 0 : index
    %0 = vector.load %arg1[%c0, %c0_0] : memref<256x32xbf16, #tpu.memory_space<vmem>>, vector<256x32xbf16>
    %c0_1 = arith.constant 0 : index
    %c0_2 = arith.constant 0 : index
    %1 = vector.load %arg2[%c0_1, %c0_2] : memref<32x128xbf16, #tpu.memory_space<vmem>>, vector<32x128xbf16>
    %cst = arith.constant dense<0.000000e+00> : vector<256x128xf32>
    %2 = tpu.matmul %0, %1, %cst {dimension_numbers = #tpu.dot_dimension_numbers<[1], [0], [0], [1], [0, 0, 1, 1], [], []>} : vector<256x32xbf16>, vector<32x128xbf16>, vector<256x128xf32> -> vector<256x128xf32>
    %c0_3 = arith.constant 0 : index
    %c0_4 = arith.constant 0 : index
    %3 = vector.load %arg3[%c0_3, %c0_4] : memref<1x128xf32, #tpu.memory_space<vmem>>, vector<1x128xf32>
    %4 = vector.broadcast %3 : vector<1x128xf32> to vector<256x128xf32>
    %5 = arith.addf %2, %4 : vector<256x128xf32>
    %cst_5 = arith.constant 0.000000e+00 : f32
    %6 = vector.broadcast %cst_5 : f32 to vector<256x128xf32>
    %7 = arith.maximumf %5, %6 : vector<256x128xf32>
    %8 = arith.truncf %7 : vector<256x128xf32> to vector<256x128xbf16>
    %c0_6 = arith.constant 0 : index
    %c0_7 = arith.constant 0 : index
    %9 = vector.load %arg4[%c0_6, %c0_7] : memref<128x256xbf16, #tpu.memory_space<vmem>>, vector<128x256xbf16>
    %cst_8 = arith.constant dense<0.000000e+00> : vector<256x256xf32>
    %10 = tpu.matmul %8, %9, %cst_8 {dimension_numbers = #tpu.dot_dimension_numbers<[1], [0], [0], [1], [0, 0, 1, 1], [], []>} : vector<256x128xbf16>, vector<128x256xbf16>, vector<256x256xf32> -> vector<256x256xf32>
    %c0_9 = arith.constant 0 : index
    %c0_10 = arith.constant 0 : index
    %11 = vector.load %arg5[%c0_9, %c0_10] : memref<1x256xf32, #tpu.memory_space<vmem>>, vector<1x256xf32>
    %12 = vector.broadcast %11 : vector<1x256xf32> to vector<256x256xf32>
    %13 = arith.addf %10, %12 : vector<256x256xf32>
    %cst_11 = arith.constant 0.000000e+00 : f32
    %14 = vector.broadcast %cst_11 : f32 to vector<256x256xf32>
    %15 = arith.maximumf %13, %14 : vector<256x256xf32>
    %16 = arith.truncf %15 : vector<256x256xf32> to vector<256x256xbf16>
    %c0_12 = arith.constant 0 : index
    %c0_13 = arith.constant 0 : index
    %17 = vector.load %arg6[%c0_12, %c0_13] : memref<256x128xbf16, #tpu.memory_space<vmem>>, vector<256x128xbf16>
    %cst_14 = arith.constant dense<0.000000e+00> : vector<256x128xf32>
    %18 = tpu.matmul %16, %17, %cst_14 {dimension_numbers = #tpu.dot_dimension_numbers<[1], [0], [0], [1], [0, 0, 1, 1], [], []>} : vector<256x256xbf16>, vector<256x128xbf16>, vector<256x128xf32> -> vector<256x128xf32>
    %c0_15 = arith.constant 0 : index
    %c0_16 = arith.constant 0 : index
    %19 = vector.load %arg7[%c0_15, %c0_16] : memref<1x128xf32, #tpu.memory_space<vmem>>, vector<1x128xf32>
    %20 = vector.broadcast %19 : vector<1x128xf32> to vector<256x128xf32>
    %21 = arith.addf %18, %20 : vector<256x128xf32>
    %c0_17 = arith.constant 0 : index
    %c0_18 = arith.constant 0 : index
    %22 = vector.load %arg8[%c0_17, %c0_18] : memref<256x128xf32, #tpu.memory_space<vmem>>, vector<256x128xf32>
    tpu.vector_store %arg8[%c0_17, %c0_18], %21 {strides = array<i32>} : memref<256x128xf32, #tpu.memory_space<vmem>>, vector<256x128xf32>,
    return
  }
  func.func @transform_0(%arg0: i32) -> (i32, i32) {
    %c0_i32 = arith.constant 0 : i32
    %c0_i32_0 = arith.constant 0 : i32
    return %arg0, %c0_i32 : i32, i32
  }
  func.func @transform_1(%arg0: i32) -> (i32, i32) {
    %c0_i32 = arith.constant 0 : i32
    %c0_i32_0 = arith.constant 0 : i32
    %c0_i32_1 = arith.constant 0 : i32
    return %c0_i32, %c0_i32_0 : i32, i32
  }
  func.func @transform_2(%arg0: i32) -> (i32, i32) {
    %c0_i32 = arith.constant 0 : i32
    %c0_i32_0 = arith.constant 0 : i32
    %c0_i32_1 = arith.constant 0 : i32
    return %c0_i32, %c0_i32_0 : i32, i32
  }
  func.func @transform_3(%arg0: i32) -> (i32, i32) {
    %c0_i32 = arith.constant 0 : i32
    %c0_i32_0 = arith.constant 0 : i32
    %c0_i32_1 = arith.constant 0 : i32
    return %c0_i32, %c0_i32_0 : i32, i32
  }
  func.func @transform_4(%arg0: i32) -> (i32, i32) {
    %c0_i32 = arith.constant 0 : i32
    %c0_i32_0 = arith.constant 0 : i32
    %c0_i32_1 = arith.constant 0 : i32
    return %c0_i32, %c0_i32_0 : i32, i32
  }
  func.func @transform_5(%arg0: i32) -> (i32, i32) {
    %c0_i32 = arith.constant 0 : i32
    %c0_i32_0 = arith.constant 0 : i32
    %c0_i32_1 = arith.constant 0 : i32
    return %c0_i32, %c0_i32_0 : i32, i32
  }
  func.func @transform_6(%arg0: i32) -> (i32, i32) {
    %c0_i32 = arith.constant 0 : i32
    %c0_i32_0 = arith.constant 0 : i32
    %c0_i32_1 = arith.constant 0 : i32
    return %c0_i32, %c0_i32_0 : i32, i32
  }
  func.func @transform_7(%arg0: i32) -> (i32, i32) {
    %c0_i32 = arith.constant 0 : i32
    %c0_i32_0 = arith.constant 0 : i32
    return %arg0, %c0_i32 : i32, i32
  }
}

</mosaic_0001>

<bundles_post_ra>
// kernel: tpu_custom_call.1
= control target key start
LH: loop header
LB: loop body
LE: loop exit
PB: predicated region body
PF: predicated region fallthrough
CT: control target
= control target key end

     0   :  { %12 = vsyncpa [#allocation3], 0  ;;  %s1808_s0 = inlined_call_operand.vmem [shape: bf16[256,32], index: 0, kind: input, shape index: {}]   ;;  %s1809_s1 = inlined_call_operand.vmem [shape: bf16[32,128], index: 1, kind: input, shape index: {}]   ;;  %s1810_s2 = inlined_call_operand.vmem [shape: f32[1,128], index: 2, kind: input, shape index: {}]   ;;  %s1811_s3 = inlined_call_operand.vmem [shape: bf16[128,256], index: 3, kind: input, shape index: {}]   ;;  %s1812_s4 = inlined_call_operand.vmem [shape: f32[1,256], index: 4, kind: input, shape index: {}]   ;;  %s1813_s5 = inlined_call_operand.hbm [shape: bf16[256,128], index: 5, kind: input, shape index: {}]   ;;  %s1814_s6 = inlined_call_operand.vmem [shape: f32[1,128], index: 6, kind: input, shape index: {}]   ;;  %s1815_s7 = inlined_call_operand.hbm [shape: f32[256,128], index: 7, kind: output, shape index: {}]  }
   0x1   :  { %13 = vsyncpa [#allocation4], 0  ;;  %s28_s26 = sshll.u32 %s1813_s5, 4  ;;  %s1439_s27 = smov [#allocation2]   ;;  %s29_s26 = int_to_ptr.hbm [resolvable:$true] %s28_s26 }
   0x2   :  { %s30_s28 = sshll.u32 %s1439_s27, 4  ;;  %s1440_s29 = smov 64   ;;  %s31_s28 = int_to_ptr.vmem [resolvable:$true] %s30_s28 }
   0x3   :  { %s1441_s30 = smov 4  }
   0x4   :  { %36 = dma.hbm_to_vmem [thread:$0]  %s29_s26, 2048, %s31_s28, [#allocation3], %s1440_s29, %s1440_s29, %s1441_s30  }
   0x5   :  { %1435 = dma.done.wait [#allocation3], 2048  }
   0x6   :  { %1436 = vsyncadd [#allocation3], 4294965248  ;;  %v1332_v0 = vld [vmem:[%s1809_s1 + $0x8] sm:$0xff]  ;;  %v1331_v1 = vld [vmem:[%s1809_s1] sm:$0xff]  ;;  %vm176_vm0 = vcmask 261120   ;;  %s1086_s12 = sshll.u32 %s1815_s7, 4  ;;  %s1087_s12 = int_to_ptr.hbm [resolvable:$true] %s1086_s12 }
   0x7   :  { %231 = vmatpush.bf16.msra.mxu0 %v1332_v0  ;;  %1365 = vmatpush.bf16.msra.mxu1 %v1332_v0  ;;  %v1315_v2 = vld [vmem:[%s1808_s0] sm:$0xff]  ;;  %v1316_v3 = vld [vmem:[%s1808_s0 + $0x8] sm:$0xff]  ;;  %v1317_v5 = vld [vmem:[%s1808_s0 + $0x10] sm:$0xff]  ;;  %s1443_s13 = smov 128   ;;  %s1444_s14 = smov 8  }
   0x8   :  { %1366 = vmatpush.bf16.msra.mxu2 %v1332_v0  ;;  %1367 = vmatpush.bf16.msra.mxu3 %v1332_v0  ;;  %v1320_v4 = vld [vmem:[%s1808_s0 + $0x28] sm:$0xff]  ;;  %v1245_v6 = vld [vmem:[%s1811_s3 + $0x70] sm:$0xf]  ;;  %v1348_v7 = vld [vmem:[%s1811_s3 + $0x74] sm:$0xf0] }
   0x9   :  { %v1321_v8 = vld [vmem:[%s1808_s0 + $0x30] sm:$0xff]  ;;  %v1246_v9 = vor.u32 %v1348_v7, %v1245_v6  ;;  %v1237_v10 = vld [vmem:[%s1811_s3 + $0x60] sm:$0xf]  ;;  %v1346_v11 = vld [vmem:[%s1811_s3 + $0x64] sm:$0xf0] }
   0xa   :  { %v1238_v12 = vor.u32 %v1346_v11, %v1237_v10  ;;  %v1325_v13 = vld [vmem:[%s1808_s0 + $0x50] sm:$0xff]  ;;  %v1344_v15 = vld [vmem:[%s1811_s3 + $0x54] sm:$0xf0]  ;;  %v1247_v17 = vld [vmem:[%s1811_s3 + $0x78] sm:$0xf0] }
   0xb   :  { %232 = vmatpush.bf16.msra.mxu0 %v1331_v1  ;;  %1368 = vmatpush.bf16.msra.mxu1 %v1331_v1  ;;  %v1229_v14 = vld [vmem:[%s1811_s3 + $0x50] sm:$0xf]  ;;  %v1347_v16 = vld [vmem:[%s1811_s3 + $0x74] sm:$0xf]  ;;  %v1345_v18 = vld [vmem:[%s1811_s3 + $0x64] sm:$0xf] }
   0xc   :  { %1369 = vmatpush.bf16.msra.mxu2 %v1331_v1  ;;  %1370 = vmatpush.bf16.msra.mxu3 %v1331_v1  ;;  %v1239_v19 = vld [vmem:[%s1811_s3 + $0x68] sm:$0xf0]  ;;  %v1250_v20 = vor.u32 %v1347_v16, %v1247_v17  ;;  %v1230_v21 = vor.u32 %v1344_v15, %v1229_v14  ;;  %v1221_v22 = vld [vmem:[%s1811_s3 + $0x40] sm:$0xf]  ;;  %v1342_v23 = vld [vmem:[%s1811_s3 + $0x44] sm:$0xf0] }
   0xd   :  { %v1242_v24 = vor.u32 %v1345_v18, %v1239_v19  ;;  %v1343_v25 = vld [vmem:[%s1811_s3 + $0x54] sm:$0xf]  ;;  %v1231_v26 = vld [vmem:[%s1811_s3 + $0x58] sm:$0xf0]  ;;  %v1222_v27 = vor.u32 %v1342_v23, %v1221_v22  ;;  %v1213_v29 = vld [vmem:[%s1811_s3 + $0x30] sm:$0xf] }
   0xe   :  { %1171 = vmatmul.msk.bf16.vlgmr.msra.gmra.mxu0 %vm176_vm0, %v1315_v2  ;;  %1176 = vmatmul.msk.bf16.vlgmr.msra.gmra.mxu1 %vm176_vm0, %v1320_v4  ;;  %v1318_v28 = vld [vmem:[%s1808_s0 + $0x18] sm:$0xff]  ;;  %v1234_v31 = vor.u32 %v1343_v25, %v1231_v26  ;;  %v1205_v34 = vld [vmem:[%s1811_s3 + $0x20] sm:$0xf]  ;;  %v1338_v35 = vld [vmem:[%s1811_s3 + $0x24] sm:$0xf0] }
   0xf   :  { %464 = vmatpush.bf16.msrb.mxu1 %v1246_v9  ;;  %1181 = vmatmul.msk.bf16.vlgmr.msra.gmra.mxu2 %vm176_vm0, %v1325_v13  ;;  %v1340_v30 = vld [vmem:[%s1811_s3 + $0x34] sm:$0xf0]  ;;  %v1341_v37 = vld [vmem:[%s1811_s3 + $0x44] sm:$0xf]  ;;  %v1223_v38 = vld [vmem:[%s1811_s3 + $0x48] sm:$0xf0]  ;;  %v1206_v39 = vor.u32 %v1338_v35, %v1205_v34 }
  0x10   :  { %553 = vmatpush.bf16.msrb.mxu2 %v1250_v20  ;;  %v1322_v32 = vld [vmem:[%s1808_s0 + $0x38] sm:$0xff]  ;;  %v1214_v33 = vor.u32 %v1340_v30, %v1213_v29  ;;  %v1226_v40 = vor.u32 %v1341_v37, %v1223_v38  ;;  %v1339_v41 = vld [vmem:[%s1811_s3 + $0x34] sm:$0xf]  ;;  %v1197_v43 = vld [vmem:[%s1811_s3 + $0x10] sm:$0xf] }
  0x11   :  { %v1326_v36 = vld [vmem:[%s1808_s0 + $0x58] sm:$0xff]  ;;  %v1319_v47 = vld [vmem:[%s1808_s0 + $0x20] sm:$0xff]  ;;  %v1324_v49 = vld [vmem:[%s1808_s0 + $0x48] sm:$0xff] }
  0x12   :  { %v1215_v42 = vld [vmem:[%s1811_s3 + $0x38] sm:$0xf0]  ;;  %v1336_v44 = vld [vmem:[%s1811_s3 + $0x14] sm:$0xf0]  ;;  %v1323_v48 = vld [vmem:[%s1808_s0 + $0x40] sm:$0xff] }
  0x13   :  { %465 = vmatpush.bf16.msrb.mxu1 %v1238_v12  ;;  %v1218_v45 = vor.u32 %v1339_v41, %v1215_v42  ;;  %v1198_v46 = vor.u32 %v1336_v44, %v1197_v43  ;;  %v1337_v50 = vld [vmem:[%s1811_s3 + $0x24] sm:$0xf]  ;;  %v1207_v51 = vld [vmem:[%s1811_s3 + $0x28] sm:$0xf0]  ;;  %v1335_v53 = vld [vmem:[%s1811_s3 + $0x14] sm:$0xf] }
  0x14   :  { %554 = vmatpush.bf16.msrb.mxu2 %v1242_v24  ;;  %v1210_v52 = vor.u32 %v1337_v50, %v1207_v51  ;;  %v1199_v54 = vld [vmem:[%s1811_s3 + $0x18] sm:$0xf0]  ;;  %v1189_v56 = vld [vmem:[%s1811_s3] sm:$0xf]  ;;  %v1334_v57 = vld [vmem:[%s1811_s3 + $0x4] sm:$0xf0] }
  0x15   :  { %v1202_v55 = vor.u32 %v1335_v53, %v1199_v54  ;;  %v1333_v58 = vld [vmem:[%s1811_s3 + $0x4] sm:$0xf]  ;;  %v1190_v59 = vor.u32 %v1334_v57, %v1189_v56  ;;  %v1191_v60 = vld [vmem:[%s1811_s3 + $0x8] sm:$0xf0]  ;;  %v1641_v63 = vld [vmem:[%s1810_s2] ss:$0 sm:$0xff] }
  0x16   :  { %v1194_v61 = vor.u32 %v1333_v58, %v1191_v60  ;;  %v1327_v7 = vld [vmem:[%s1808_s0 + $0x60] sm:$0xff]  ;;  %v1328_v15 = vld [vmem:[%s1808_s0 + $0x68] sm:$0xff]  ;;  %v1329_v24 = vld [vmem:[%s1808_s0 + $0x70] sm:$0xff] }
  0x17   :  { %466 = vmatpush.bf16.msrb.mxu1 %v1230_v21  ;;  %1183 = vmatmul.msk.bf16.vlgmr.msra.gmra.mxu3 %vm176_vm0, %v1327_v7  ;;  %v1364_v35 = vld [vmem:[#allocation2 + $0x78] sm:$0xff]  ;;  %v1355_v37 = vld [vmem:[#allocation2 + $0x30] sm:$0xff]  ;;  %v1361_v57 = vld [vmem:[#allocation2 + $0x60] sm:$0xff] }
  0x18   :  { %555 = vmatpush.bf16.msrb.mxu2 %v1234_v31  ;;  %959 = vmatpush.bf16.msrb.mxu0 %v1364_v35  ;;  %v1352_v56 = vld [vmem:[#allocation2 + $0x18] sm:$0xff]  ;;  %v1351_v58 = vld [vmem:[#allocation2 + $0x10] sm:$0xff] }
  0x1b   :  { %467 = vmatpush.bf16.msrb.mxu1 %v1222_v27 }
  0x1c   :  { %556 = vmatpush.bf16.msrb.mxu2 %v1226_v40 }
  0x1e   :  { %1172 = vmatmul.msk.bf16.gmra.mxu0 %vm176_vm0, %v1316_v3  ;;  %1177 = vmatmul.msk.bf16.gmra.mxu1 %vm176_vm0, %v1321_v8 }
  0x1f   :  { %468 = vmatpush.bf16.msrb.mxu1 %v1214_v33  ;;  %1182 = vmatmul.msk.bf16.gmra.mxu2 %vm176_vm0, %v1326_v36  ;;  %v1356_v33 = vld [vmem:[#allocation2 + $0x38] sm:$0xff] }
  0x20   :  { %557 = vmatpush.bf16.msrb.mxu2 %v1218_v45  ;;  %870 = vmatpush.bf16.msrb.mxu3 %v1356_v33  ;;  %v1330_v36 = vld [vmem:[%s1808_s0 + $0x78] sm:$0xff]  ;;  %v1354_v45 = vld [vmem:[#allocation2 + $0x28] sm:$0xff] }
  0x23   :  { %469 = vmatpush.bf16.msrb.mxu1 %v1206_v39 }
  0x24   :  { %558 = vmatpush.bf16.msrb.mxu2 %v1210_v52  ;;  %871 = vmatpush.bf16.msrb.mxu3 %v1355_v37 }
  0x27   :  { %470 = vmatpush.bf16.msrb.mxu1 %v1198_v46  ;;  %1184 = vmatmul.msk.bf16.gmra.mxu3 %vm176_vm0, %v1328_v15  ;;  %v1363_v46 = vld [vmem:[#allocation2 + $0x70] sm:$0xff]  ;;  %v1357_v15 = vld [vmem:[#allocation2 + $0x40] sm:$0xff] }
  0x28   :  { %559 = vmatpush.bf16.msrb.mxu2 %v1202_v55  ;;  %872 = vmatpush.bf16.msrb.mxu3 %v1354_v45 }
  0x29   :  { %960 = vmatpush.bf16.msrb.mxu0 %v1363_v46 }
  0x2b   :  { %471 = vmatpush.bf16.msrb.mxu1 %v1190_v59 }
  0x2c   :  { %560 = vmatpush.bf16.msrb.mxu2 %v1194_v61 }
  0x2e   :  { %1173 = vmatmul.msk.bf16.gmra.mxu0 %vm176_vm0, %v1317_v5  ;;  %1178 = vmatmul.msk.bf16.gmra.mxu1 %vm176_vm0, %v1322_v32 }
  0x30   :  { %1371 = vmatpush.bf16.msra.mxu2 %v1364_v35 }
  0x34   :  { %1372 = vmatpush.bf16.msra.mxu2 %v1363_v46 }
  0x37   :  { %1185 = vmatmul.msk.bf16.gmra.mxu3 %vm176_vm0, %v1329_v24  ;;  %v378_v24 = vld [vmem:[%s1812_s4] sm:$0x3] }
  0x38   :  { %v1689_v33 = vperm.slane %v378_v24, 1 }
  0x3e   :  { %1174 = vmatmul.msk.bf16.gmra.mxu0 %vm176_vm0, %v1318_v28  ;;  %1179 = vmatmul.msk.bf16.gmra.mxu1 %vm176_vm0, %v1323_v48  ;;  %v1362_v48 = vld [vmem:[#allocation2 + $0x68] sm:$0xff] }
  0x3f   :  { %961 = vmatpush.bf16.msrb.mxu0 %v1362_v48  ;;  %1373 = vmatpush.bf16.msra.mxu2 %v1362_v48 }
  0x43   :  { %962 = vmatpush.bf16.msrb.mxu0 %v1361_v57  ;;  %1374 = vmatpush.bf16.msra.mxu2 %v1361_v57 }
  0x47   :  { %1186 = vmatmul.msk.bf16.gmra.mxu3 %vm176_vm0, %v1330_v36 }
  0x4e   :  { %1175 = vmatmul.msk.bf16.gmra.mxu0 %vm176_vm0, %v1319_v47  ;;  %1180 = vmatmul.msk.bf16.gmra.mxu1 %vm176_vm0, %v1324_v49  ;;  %v1353_v47 = vld [vmem:[#allocation2 + $0x20] sm:$0xff] }
  0x4f   :  { %873 = vmatpush.bf16.msrb.mxu3 %v1353_v47 }
  0x53   :  { %874 = vmatpush.bf16.msrb.mxu3 %v1352_v56 }
  0x57   :  { %875 = vmatpush.bf16.msrb.mxu3 %v1351_v58 }
  0x8b   :  { %v234_v62 = vpop.f32.mrf.mxu0  ;;  %v259_v19 = vpop.f32.mrf.mxu1 }
  0x8c   :  { %v235_v0 = vadd.f32 %v1641_v63, %v234_v62  ;;  %v260_v50 = vadd.f32 %v1641_v63, %v259_v19 }
  0x8e   :  { %v314_v3 = vmax.f32 %v235_v0, 0.0  ;;  %v324_v52 = vmax.f32 %v260_v50, 0.0 }
  0x93   :  { %v236_v1 = vpop.f32.mrf.mxu0  ;;  %v261_v25 = vpop.f32.mrf.mxu1 }
  0x94   :  { %v237_v2 = vadd.f32 %v1641_v63, %v236_v1  ;;  %v262_v51 = vadd.f32 %v1641_v63, %v261_v25  ;;  %v1673_v1 = vpop.f32.mrf.mxu2 }
  0x96   :  { %v315_v4 = vmax.f32 %v237_v2, 0.0  ;;  %v325_v53 = vmax.f32 %v262_v51, 0.0  ;;  %v285_v51 = vadd.f32 %v1641_v63, %v1673_v1 }
  0x98   :  { %v346_v5 = vpack.c.bf16 %v315_v4, %v314_v3  ;;  %v351_v55 = vpack.c.bf16 %v325_v53, %v324_v52  ;;  %v1350_v3 = vld [vmem:[#allocation2 + $0x8] sm:$0xff]  ;;  %v1360_v4 = vld [vmem:[#allocation2 + $0x58] sm:$0xff]  ;;  %v334_v56 = vmax.f32 %v285_v51, 0.0 }
  0x99   :  { %876 = vmatpush.bf16.msrb.mxu3 %v1350_v3  ;;  %963 = vmatpush.bf16.msrb.mxu0 %v1360_v4 }
  0x9a   :  { %472 = vmatmul.bf16.vlgmr.msrb.gmra.mxu1 %v346_v5  ;;  %561 = vmatmul.bf16.vlgmr.msrb.gmra.mxu2 %v346_v5 }
  0x9b   :  { %v239_v6 = vpop.f32.mrf.mxu0  ;;  %v264_v32 = vpop.f32.mrf.mxu1  ;;  %1375 = vmatpush.bf16.msra.mxu2 %v1360_v4 }
  0x9c   :  { %v240_v8 = vadd.f32 %v1641_v63, %v239_v6  ;;  %v265_v59 = vadd.f32 %v1641_v63, %v264_v32  ;;  %v1359_v6 = vld [vmem:[#allocation2 + $0x50] sm:$0xff] }
  0x9d   :  { %964 = vmatpush.bf16.msrb.mxu0 %v1359_v6 }
  0x9e   :  { %v316_v11 = vmax.f32 %v240_v8, 0.0  ;;  %v326_v62 = vmax.f32 %v265_v59, 0.0 }
  0x9f   :  { %1376 = vmatpush.bf16.msra.mxu2 %v1359_v6 }
  0xa3   :  { %v241_v9 = vpop.f32.mrf.mxu0  ;;  %v266_v40 = vpop.f32.mrf.mxu1 }
  0xa4   :  { %v242_v10 = vadd.f32 %v1641_v63, %v241_v9  ;;  %v267_v60 = vadd.f32 %v1641_v63, %v266_v40  ;;  %v286_v9 = vpop.f32.mrf.mxu2 }
  0xa5   :  { %v287_v52 = vadd.f32 %v1641_v63, %v286_v9 }
  0xa6   :  { %v317_v12 = vmax.f32 %v242_v10, 0.0  ;;  %v327_v0 = vmax.f32 %v267_v60, 0.0  ;;  %v1349_v10 = vld [vmem:[#allocation2] sm:$0xff] }
  0xa7   :  { %877 = vmatpush.bf16.msrb.mxu3 %v1349_v10  ;;  %v335_v57 = vmax.f32 %v287_v52, 0.0 }
  0xa8   :  { %v347_v13 = vpack.c.bf16 %v317_v12, %v316_v11  ;;  %v352_v2 = vpack.c.bf16 %v327_v0, %v326_v62  ;;  %v1358_v11 = vld [vmem:[#allocation2 + $0x48] sm:$0xff]  ;;  %v294_v0 = vpop.f32.mrf.mxu3 }
  0xa9   :  { %965 = vmatpush.bf16.msrb.mxu0 %v1358_v11  ;;  %1377 = vmatpush.bf16.msra.mxu2 %v1358_v11  ;;  %v356_v1 = vpack.c.bf16 %v335_v57, %v334_v56 }
  0xaa   :  { %477 = vmatmul.bf16.gmra.mxu1 %v347_v13  ;;  %566 = vmatmul.bf16.gmra.mxu2 %v347_v13 }
  0xab   :  { %v244_v14 = vpop.f32.mrf.mxu0  ;;  %v269_v49 = vpop.f32.mrf.mxu1 }
  0xac   :  { %v245_v16 = vadd.f32 %v1641_v63, %v244_v14  ;;  %v270_v7 = vadd.f32 %v1641_v63, %v269_v49 }
  0xad   :  { %966 = vmatpush.bf16.msrb.mxu0 %v1357_v15  ;;  %1378 = vmatpush.bf16.msra.mxu2 %v1357_v15 }
  0xae   :  { %v318_v20 = vmax.f32 %v245_v16, 0.0  ;;  %v328_v12 = vmax.f32 %v270_v7, 0.0 }
  0xb0   :  { %v296_v11 = vpop.f32.mrf.mxu3 }
  0xb3   :  { %v246_v17 = vpop.f32.mrf.mxu0  ;;  %v271_v54 = vpop.f32.mrf.mxu1 }
  0xb4   :  { %v247_v18 = vadd.f32 %v1641_v63, %v246_v17  ;;  %v272_v8 = vadd.f32 %v1641_v63, %v271_v54  ;;  %v1677_v17 = vpop.f32.mrf.mxu2 }
  0xb6   :  { %v319_v21 = vmax.f32 %v247_v18, 0.0  ;;  %v329_v13 = vmax.f32 %v272_v8, 0.0  ;;  %v290_v8 = vadd.f32 %v1641_v63, %v1677_v17 }
  0xb8   :  { %v348_v22 = vpack.c.bf16 %v319_v21, %v318_v20  ;;  %v353_v16 = vpack.c.bf16 %v329_v13, %v328_v12 }
  0xba   :  { %482 = vmatmul.bf16.gmra.mxu1 %v348_v22  ;;  %571 = vmatmul.bf16.gmra.mxu2 %v348_v22 }
  0xbb   :  { %v249_v23 = vpop.f32.mrf.mxu0  ;;  %v274_v61 = vpop.f32.mrf.mxu1 }
  0xbc   :  { %v250_v26 = vadd.f32 %v1641_v63, %v249_v23  ;;  %v275_v19 = vadd.f32 %v1641_v63, %v274_v61  ;;  %v291_v23 = vpop.f32.mrf.mxu2 }
  0xbd   :  { %v292_v9 = vadd.f32 %v1641_v63, %v291_v23 }
  0xbe   :  { %v320_v29 = vmax.f32 %v250_v26, 0.0  ;;  %v330_v21 = vmax.f32 %v275_v19, 0.0 }
  0xbf   :  { %v337_v15 = vmax.f32 %v292_v9, 0.0 }
  0xc3   :  { %v251_v27 = vpop.f32.mrf.mxu0  ;;  %v276_v5 = vpop.f32.mrf.mxu1 }
  0xc4   :  { %v252_v28 = vadd.f32 %v1641_v63, %v251_v27  ;;  %v277_v20 = vadd.f32 %v1641_v63, %v276_v5  ;;  %v1684_v27 = vperm.slane %v378_v24, 0 }
  0xc6   :  { %v321_v30 = vmax.f32 %v252_v28, 0.0  ;;  %v331_v22 = vmax.f32 %v277_v20, 0.0 }
  0xc8   :  { %v349_v31 = vpack.c.bf16 %v321_v30, %v320_v29  ;;  %v354_v26 = vpack.c.bf16 %v331_v22, %v330_v21 }
  0xca   :  { %487 = vmatmul.bf16.gmra.mxu1 %v349_v31  ;;  %576 = vmatmul.bf16.gmra.mxu2 %v349_v31 }
  0xcb   :  { %v254_v34 = vpop.f32.mrf.mxu0  ;;  %v279_v14 = vpop.f32.mrf.mxu1 }
  0xcc   :  { %v255_v38 = vadd.f32 %v1641_v63, %v254_v34  ;;  %v280_v31 = vadd.f32 %v1641_v63, %v279_v14  ;;  %v336_v14 = vmax.f32 %v290_v8, 0.0 }
  0xce   :  { %v322_v42 = vmax.f32 %v255_v38, 0.0  ;;  %v332_v37 = vmax.f32 %v280_v31, 0.0  ;;  %v357_v17 = vpack.c.bf16 %v337_v15, %v336_v14  ;;  %v297_v31 = vadd.f32 %v1641_v63, %v296_v11 }
  0xd3   :  { %v256_v39 = vpop.f32.mrf.mxu0  ;;  %v281_v18 = vpop.f32.mrf.mxu1 }
  0xd4   :  { %v257_v41 = vadd.f32 %v1641_v63, %v256_v39  ;;  %v282_v32 = vadd.f32 %v1641_v63, %v281_v18 }
  0xd6   :  { %v323_v43 = vmax.f32 %v257_v41, 0.0  ;;  %v333_v38 = vmax.f32 %v282_v32, 0.0 }
  0xd8   :  { %v350_v44 = vpack.c.bf16 %v323_v43, %v322_v42  ;;  %v355_v46 = vpack.c.bf16 %v333_v38, %v332_v37  ;;  %v339_v37 = vmax.f32 %v297_v31, 0.0 }
  0xda   :  { %492 = vmatmul.bf16.gmra.mxu1 %v350_v44  ;;  %581 = vmatmul.bf16.gmra.mxu2 %v350_v44 }
  0xea   :  { %497 = vmatmul.bf16.gmra.mxu1 %v351_v55  ;;  %586 = vmatmul.bf16.gmra.mxu2 %v351_v55 }
  0xfa   :  { %502 = vmatmul.bf16.gmra.mxu1 %v352_v2  ;;  %591 = vmatmul.bf16.gmra.mxu2 %v352_v2 }
 0x10a   :  { %507 = vmatmul.bf16.gmra.mxu1 %v353_v16  ;;  %596 = vmatmul.bf16.gmra.mxu2 %v353_v16 }
 0x117   :  { %v473_v25 = vpop.f32.mrf.mxu1 }
 0x118   :  { %v474_v29 = vadd.f32 %v473_v25, %v1684_v27  ;;  %v299_v25 = vpop.f32.mrf.mxu3 }
 0x119   :  { %v300_v52 = vadd.f32 %v1641_v63, %v299_v25 }
 0x11a   :  { %512 = vmatmul.bf16.gmra.mxu1 %v354_v26  ;;  %601 = vmatmul.bf16.gmra.mxu2 %v354_v26  ;;  %v642_v35 = vmax.f32 %v474_v29, 0.0 }
 0x11b   :  { %v340_v57 = vmax.f32 %v300_v52, 0.0 }
 0x11d   :  { %v562_v28 = vpop.f32.mrf.mxu2 }
 0x11e   :  { %v563_v39 = vadd.f32 %v562_v28, %v1689_v33 }
 0x11f   :  { %v475_v30 = vpop.f32.mrf.mxu1 }
 0x120   :  { %v476_v34 = vadd.f32 %v475_v30, %v1684_v27  ;;  %v643_v44 = vmax.f32 %v563_v39, 0.0  ;;  %v295_v30 = vadd.f32 %v1641_v63, %v294_v0 }
 0x122   :  { %v644_v36 = vmax.f32 %v476_v34, 0.0 }
 0x124   :  { %v706_v40 = vpack.c.bf16 %v644_v36, %v642_v35  ;;  %v338_v36 = vmax.f32 %v295_v30, 0.0 }
 0x125   :  { %v564_v41 = vpop.f32.mrf.mxu2 }
 0x126   :  { %v565_v42 = vadd.f32 %v564_v41, %v1689_v33  ;;  %878 = vmatmul.bf16.vlgmr.msrb.gmra.mxu3 %v706_v40  ;;  %v301_v41 = vpop.f32.mrf.mxu3 }
 0x127   :  { %v478_v43 = vpop.f32.mrf.mxu1 }
 0x128   :  { %v645_v45 = vmax.f32 %v565_v42, 0.0  ;;  %v479_v49 = vadd.f32 %v478_v43, %v1684_v27 }
 0x12a   :  { %517 = vmatmul.bf16.gmra.mxu1 %v355_v46  ;;  %606 = vmatmul.bf16.gmra.mxu2 %v355_v46  ;;  %v707_v47 = vpack.c.bf16 %v645_v45, %v643_v44  ;;  %v646_v54 = vmax.f32 %v479_v49, 0.0  ;;  %v358_v46 = vpack.c.bf16 %v339_v37, %v338_v36 }
 0x12c   :  { %967 = vmatmul.bf16.vlgmr.msrb.gmra.mxu0 %v707_v47 }
 0x12d   :  { %v567_v48 = vpop.f32.mrf.mxu2 }
 0x12e   :  { %v568_v58 = vadd.f32 %v567_v48, %v1689_v33  ;;  %v304_v51 = vpop.f32.mrf.mxu3 }
 0x12f   :  { %v480_v50 = vpop.f32.mrf.mxu1  ;;  %v305_v9 = vadd.f32 %v1641_v63, %v304_v51 }
 0x130   :  { %v481_v53 = vadd.f32 %v480_v50, %v1684_v27  ;;  %v647_v2 = vmax.f32 %v568_v58, 0.0 }
 0x131   :  { %v342_v15 = vmax.f32 %v305_v9, 0.0 }
 0x132   :  { %v648_v55 = vmax.f32 %v481_v53, 0.0  ;;  %v302_v53 = vadd.f32 %v1641_v63, %v301_v41 }
 0x134   :  { %v708_v59 = vpack.c.bf16 %v648_v55, %v646_v54  ;;  %v341_v58 = vmax.f32 %v302_v53, 0.0 }
 0x135   :  { %v569_v60 = vpop.f32.mrf.mxu2 }
 0x136   :  { %v570_v61 = vadd.f32 %v569_v60, %v1689_v33  ;;  %883 = vmatmul.bf16.gmra.mxu3 %v708_v59 }
 0x137   :  { %v483_v62 = vpop.f32.mrf.mxu1 }
 0x138   :  { %v649_v3 = vmax.f32 %v570_v61, 0.0  ;;  %v484_v6 = vadd.f32 %v483_v62, %v1684_v27 }
 0x13a   :  { %522 = vmatmul.bf16.gmra.mxu1 %v356_v1  ;;  %611 = vmatmul.bf16.gmra.mxu2 %v356_v1  ;;  %v709_v4 = vpack.c.bf16 %v649_v3, %v647_v2  ;;  %v650_v12 = vmax.f32 %v484_v6, 0.0  ;;  %v359_v1 = vpack.c.bf16 %v341_v58, %v340_v57 }
 0x13c   :  { %972 = vmatmul.bf16.gmra.mxu0 %v709_v4  ;;  %v306_v4 = vpop.f32.mrf.mxu3 }
 0x13d   :  { %v572_v5 = vpop.f32.mrf.mxu2 }
 0x13e   :  { %v573_v16 = vadd.f32 %v572_v5, %v1689_v33 }
 0x13f   :  { %v485_v7 = vpop.f32.mrf.mxu1 }
 0x140   :  { %v486_v10 = vadd.f32 %v485_v7, %v1684_v27  ;;  %v651_v22 = vmax.f32 %v573_v16, 0.0 }
 0x142   :  { %v652_v13 = vmax.f32 %v486_v10, 0.0  ;;  %v307_v10 = vadd.f32 %v1641_v63, %v306_v4 }
 0x144   :  { %v710_v18 = vpack.c.bf16 %v652_v13, %v650_v12  ;;  %v309_v14 = vpop.f32.mrf.mxu3  ;;  %v343_v16 = vmax.f32 %v307_v10, 0.0 }
 0x145   :  { %v574_v19 = vpop.f32.mrf.mxu2  ;;  %v310_v31 = vadd.f32 %v1641_v63, %v309_v14 }
 0x146   :  { %v575_v20 = vadd.f32 %v574_v19, %v1689_v33  ;;  %888 = vmatmul.bf16.gmra.mxu3 %v710_v18 }
 0x147   :  { %v488_v21 = vpop.f32.mrf.mxu1  ;;  %v344_v37 = vmax.f32 %v310_v31, 0.0 }
 0x148   :  { %v653_v24 = vmax.f32 %v575_v20, 0.0  ;;  %v489_v28 = vadd.f32 %v488_v21, %v1684_v27 }
 0x14a   :  { %527 = vmatmul.bf16.gmra.mxu1 %v357_v17  ;;  %616 = vmatmul.bf16.gmra.mxu2 %v357_v17  ;;  %v711_v23 = vpack.c.bf16 %v653_v24, %v651_v22  ;;  %v654_v34 = vmax.f32 %v489_v28, 0.0 }
 0x14c   :  { %977 = vmatmul.bf16.gmra.mxu0 %v711_v23  ;;  %v360_v23 = vpack.c.bf16 %v343_v16, %v342_v15 }
 0x14d   :  { %v577_v26 = vpop.f32.mrf.mxu2 }
 0x14e   :  { %v578_v38 = vadd.f32 %v577_v26, %v1689_v33  ;;  %v311_v26 = vpop.f32.mrf.mxu3 }
 0x14f   :  { %v490_v29 = vpop.f32.mrf.mxu1 }
 0x150   :  { %v491_v32 = vadd.f32 %v490_v29, %v1684_v27  ;;  %v655_v44 = vmax.f32 %v578_v38, 0.0 }
 0x152   :  { %v656_v35 = vmax.f32 %v491_v32, 0.0  ;;  %v312_v32 = vadd.f32 %v1641_v63, %v311_v26 }
 0x154   :  { %v712_v39 = vpack.c.bf16 %v656_v35, %v654_v34  ;;  %v345_v38 = vmax.f32 %v312_v32, 0.0 }
 0x155   :  { %v579_v40 = vpop.f32.mrf.mxu2 }
 0x156   :  { %v580_v42 = vadd.f32 %v579_v40, %v1689_v33  ;;  %893 = vmatmul.bf16.gmra.mxu3 %v712_v39 }
 0x157   :  { %v493_v43 = vpop.f32.mrf.mxu1 }
 0x158   :  { %v657_v45 = vmax.f32 %v580_v42, 0.0  ;;  %v494_v49 = vadd.f32 %v493_v43, %v1684_v27 }
 0x15a   :  { %532 = vmatmul.bf16.gmra.mxu1 %v358_v46  ;;  %621 = vmatmul.bf16.gmra.mxu2 %v358_v46  ;;  %v713_v47 = vpack.c.bf16 %v657_v45, %v655_v44  ;;  %v658_v55 = vmax.f32 %v494_v49, 0.0  ;;  %v361_v46 = vpack.c.bf16 %v345_v38, %v344_v37 }
 0x15c   :  { %982 = vmatmul.bf16.gmra.mxu0 %v713_v47 }
 0x15d   :  { %v582_v48 = vpop.f32.mrf.mxu2 }
 0x15e   :  { %v583_v59 = vadd.f32 %v582_v48, %v1689_v33 }
 0x15f   :  { %v495_v50 = vpop.f32.mrf.mxu1 }
 0x160   :  { %v496_v54 = vadd.f32 %v495_v50, %v1684_v27  ;;  %v659_v2 = vmax.f32 %v583_v59, 0.0 }
 0x162   :  { %v660_v56 = vmax.f32 %v496_v54, 0.0 }
 0x164   :  { %v714_v60 = vpack.c.bf16 %v660_v56, %v658_v55 }
 0x165   :  { %v584_v61 = vpop.f32.mrf.mxu2 }
 0x166   :  { %v585_v62 = vadd.f32 %v584_v61, %v1689_v33  ;;  %898 = vmatmul.bf16.gmra.mxu3 %v714_v60 }
 0x167   :  { %v498_v0 = vpop.f32.mrf.mxu1 }
 0x168   :  { %v661_v3 = vmax.f32 %v585_v62, 0.0  ;;  %v499_v7 = vadd.f32 %v498_v0, %v1684_v27 }
 0x16a   :  { %537 = vmatmul.bf16.gmra.mxu1 %v359_v1  ;;  %626 = vmatmul.bf16.gmra.mxu2 %v359_v1  ;;  %v715_v5 = vpack.c.bf16 %v661_v3, %v659_v2  ;;  %v662_v12 = vmax.f32 %v499_v7, 0.0 }
 0x16c   :  { %987 = vmatmul.bf16.gmra.mxu0 %v715_v5 }
 0x16d   :  { %v587_v6 = vpop.f32.mrf.mxu2 }
 0x16e   :  { %v588_v18 = vadd.f32 %v587_v6, %v1689_v33 }
 0x16f   :  { %v500_v8 = vpop.f32.mrf.mxu1 }
 0x170   :  { %v501_v11 = vadd.f32 %v500_v8, %v1684_v27  ;;  %v663_v24 = vmax.f32 %v588_v18, 0.0  ;;  %v1743_v8 = vld [vmem:[%s1814_s6] ss:$0 sm:$0xff]  ;;  %s1442_s6 = smov [#allocation5]  }
 0x171   :  { %s1084_s10 = sshll.u32 %s1442_s6, 4  ;;  %s1085_s10 = int_to_ptr.vmem [resolvable:$true] %s1084_s10 }
 0x172   :  { %v664_v13 = vmax.f32 %v501_v11, 0.0 }
 0x174   :  { %v716_v19 = vpack.c.bf16 %v664_v13, %v662_v12 }
 0x175   :  { %v589_v20 = vpop.f32.mrf.mxu2 }
 0x176   :  { %v590_v21 = vadd.f32 %v589_v20, %v1689_v33  ;;  %903 = vmatmul.bf16.gmra.mxu3 %v716_v19 }
 0x177   :  { %v503_v22 = vpop.f32.mrf.mxu1 }
 0x178   :  { %v665_v17 = vmax.f32 %v590_v21, 0.0  ;;  %v504_v29 = vadd.f32 %v503_v22, %v1684_v27 }
 0x17a   :  { %542 = vmatmul.bf16.gmra.mxu1 %v360_v23  ;;  %631 = vmatmul.bf16.gmra.mxu2 %v360_v23  ;;  %v717_v25 = vpack.c.bf16 %v665_v17, %v663_v24  ;;  %v666_v35 = vmax.f32 %v504_v29, 0.0 }
 0x17c   :  { %992 = vmatmul.bf16.gmra.mxu0 %v717_v25 }
 0x17d   :  { %v592_v28 = vpop.f32.mrf.mxu2 }
 0x17e   :  { %v593_v39 = vadd.f32 %v592_v28, %v1689_v33 }
 0x17f   :  { %v505_v30 = vpop.f32.mrf.mxu1 }
 0x180   :  { %v506_v34 = vadd.f32 %v505_v30, %v1684_v27  ;;  %v667_v44 = vmax.f32 %v593_v39, 0.0 }
 0x182   :  { %v668_v36 = vmax.f32 %v506_v34, 0.0 }
 0x184   :  { %v718_v40 = vpack.c.bf16 %v668_v36, %v666_v35 }
 0x185   :  { %v594_v41 = vpop.f32.mrf.mxu2 }
 0x186   :  { %v595_v42 = vadd.f32 %v594_v41, %v1689_v33  ;;  %908 = vmatmul.bf16.gmra.mxu3 %v718_v40 }
 0x187   :  { %v508_v43 = vpop.f32.mrf.mxu1 }
 0x188   :  { %v669_v45 = vmax.f32 %v595_v42, 0.0  ;;  %v509_v48 = vadd.f32 %v508_v43, %v1684_v27 }
 0x18a   :  { %547 = vmatmul.bf16.gmra.mxu1 %v361_v46  ;;  %636 = vmatmul.bf16.gmra.mxu2 %v361_v46  ;;  %v719_v63 = vpack.c.bf16 %v669_v45, %v667_v44  ;;  %v670_v51 = vmax.f32 %v509_v48, 0.0 }
 0x18c   :  { %997 = vmatmul.bf16.gmra.mxu0 %v719_v63 }
 0x18d   :  { %v597_v47 = vpop.f32.mrf.mxu2 }
 0x18e   :  { %v598_v53 = vadd.f32 %v597_v47, %v1689_v33 }
 0x18f   :  { %v510_v49 = vpop.f32.mrf.mxu1 }
 0x190   :  { %v511_v50 = vadd.f32 %v510_v49, %v1684_v27  ;;  %v671_v58 = vmax.f32 %v598_v53, 0.0 }
 0x192   :  { %v672_v52 = vmax.f32 %v511_v50, 0.0 }
 0x194   :  { %v720_v54 = vpack.c.bf16 %v672_v52, %v670_v51 }
 0x195   :  { %v599_v55 = vpop.f32.mrf.mxu2 }
 0x196   :  { %v600_v56 = vadd.f32 %v599_v55, %v1689_v33  ;;  %913 = vmatmul.bf16.gmra.mxu3 %v720_v54 }
 0x197   :  { %v513_v57 = vpop.f32.mrf.mxu1 }
 0x198   :  { %v673_v59 = vmax.f32 %v600_v56, 0.0  ;;  %v514_v62 = vadd.f32 %v513_v57, %v1684_v27 }
 0x19a   :  { %v721_v60 = vpack.c.bf16 %v673_v59, %v671_v58  ;;  %v674_v3 = vmax.f32 %v514_v62, 0.0 }
 0x19c   :  { %1002 = vmatmul.bf16.gmra.mxu0 %v721_v60 }
 0x19d   :  { %v602_v61 = vpop.f32.mrf.mxu2 }
 0x19e   :  { %v603_v4 = vadd.f32 %v602_v61, %v1689_v33 }
 0x19f   :  { %v515_v0 = vpop.f32.mrf.mxu1 }
 0x1a0   :  { %v516_v2 = vadd.f32 %v515_v0, %v1684_v27  ;;  %v675_v10 = vmax.f32 %v603_v4, 0.0 }
 0x1a2   :  { %v676_v1 = vmax.f32 %v516_v2, 0.0 }
 0x1a4   :  { %v722_v5 = vpack.c.bf16 %v676_v1, %v674_v3 }
 0x1a5   :  { %v604_v6 = vpop.f32.mrf.mxu2 }
 0x1a6   :  { %v605_v7 = vadd.f32 %v604_v6, %v1689_v33  ;;  %918 = vmatmul.bf16.gmra.mxu3 %v722_v5 }
 0x1a7   :  { %v518_v9 = vpop.f32.mrf.mxu1 }
 0x1a8   :  { %v677_v11 = vmax.f32 %v605_v7, 0.0  ;;  %v519_v19 = vadd.f32 %v518_v9, %v1684_v27 }
 0x1a9   :  { %v879_v12 = vpop.f32.mrf.mxu3  ;;  %v968_v13 = vpop.f32.mrf.mxu0 }
 0x1aa   :  { %v723_v14 = vpack.c.bf16 %v677_v11, %v675_v10  ;;  %v880_v15 = vadd.f32 %v1743_v8, %v879_v12  ;;  %v678_v17 = vmax.f32 %v519_v19, 0.0 }
 0x1ac   :  { %v969_v16 = vadd.f32 %v968_v13, %v880_v15  ;;  %1007 = vmatmul.bf16.gmra.mxu0 %v723_v14 }
 0x1ad   :  { %v607_v18 = vpop.f32.mrf.mxu2 }
 0x1ae   :  { %1048 = vst [vmem:[#allocation5] sm:$0xff] %v969_v16  ;;  %v608_v26 = vadd.f32 %v607_v18, %v1689_v33 }
 0x1af   :  { %v520_v20 = vpop.f32.mrf.mxu1 }
 0x1b0   :  { %v521_v21 = vadd.f32 %v520_v20, %v1684_v27  ;;  %v679_v34 = vmax.f32 %v608_v26, 0.0 }
 0x1b1   :  { %v881_v22 = vpop.f32.mrf.mxu3  ;;  %v970_v24 = vpop.f32.mrf.mxu0 }
 0x1b2   :  { %v680_v23 = vmax.f32 %v521_v21, 0.0  ;;  %v882_v25 = vadd.f32 %v1743_v8, %v881_v22 }
 0x1b4   :  { %v724_v28 = vpack.c.bf16 %v680_v23, %v678_v17  ;;  %v971_v29 = vadd.f32 %v970_v24, %v882_v25 }
 0x1b5   :  { %v609_v30 = vpop.f32.mrf.mxu2 }
 0x1b6   :  { %1049 = vst [vmem:[#allocation5 + $0x8] sm:$0xff] %v971_v29  ;;  %v610_v31 = vadd.f32 %v609_v30, %v1689_v33  ;;  %923 = vmatmul.bf16.gmra.mxu3 %v724_v28 }
 0x1b7   :  { %v523_v32 = vpop.f32.mrf.mxu1 }
 0x1b8   :  { %v681_v35 = vmax.f32 %v610_v31, 0.0  ;;  %v524_v42 = vadd.f32 %v523_v32, %v1684_v27 }
 0x1b9   :  { %v884_v36 = vpop.f32.mrf.mxu3  ;;  %v973_v37 = vpop.f32.mrf.mxu0 }
 0x1ba   :  { %v725_v38 = vpack.c.bf16 %v681_v35, %v679_v34  ;;  %v885_v39 = vadd.f32 %v1743_v8, %v884_v36  ;;  %v682_v63 = vmax.f32 %v524_v42, 0.0 }
 0x1bc   :  { %v974_v40 = vadd.f32 %v973_v37, %v885_v39  ;;  %1012 = vmatmul.bf16.gmra.mxu0 %v725_v38 }
 0x1bd   :  { %v612_v41 = vpop.f32.mrf.mxu2 }
 0x1be   :  { %1050 = vst [vmem:[#allocation5 + $0x10] sm:$0xff] %v974_v40  ;;  %v613_v49 = vadd.f32 %v612_v41, %v1689_v33 }
 0x1bf   :  { %v525_v43 = vpop.f32.mrf.mxu1 }
 0x1c0   :  { %v526_v44 = vadd.f32 %v525_v43, %v1684_v27  ;;  %v683_v55 = vmax.f32 %v613_v49, 0.0 }
 0x1c1   :  { %v886_v45 = vpop.f32.mrf.mxu3  ;;  %v975_v46 = vpop.f32.mrf.mxu0 }
 0x1c2   :  { %v684_v47 = vmax.f32 %v526_v44, 0.0  ;;  %v887_v48 = vadd.f32 %v1743_v8, %v886_v45 }
 0x1c4   :  { %v726_v50 = vpack.c.bf16 %v684_v47, %v682_v63  ;;  %v976_v51 = vadd.f32 %v975_v46, %v887_v48 }
 0x1c5   :  { %v614_v52 = vpop.f32.mrf.mxu2 }
 0x1c6   :  { %1051 = vst [vmem:[#allocation5 + $0x18] sm:$0xff] %v976_v51  ;;  %v615_v53 = vadd.f32 %v614_v52, %v1689_v33  ;;  %928 = vmatmul.bf16.gmra.mxu3 %v726_v50 }
 0x1c7   :  { %v528_v54 = vpop.f32.mrf.mxu1 }
 0x1c8   :  { %v685_v56 = vmax.f32 %v615_v53, 0.0  ;;  %v529_v0 = vadd.f32 %v528_v54, %v1684_v27 }
 0x1c9   :  { %v889_v57 = vpop.f32.mrf.mxu3  ;;  %v978_v58 = vpop.f32.mrf.mxu0 }
 0x1ca   :  { %v727_v59 = vpack.c.bf16 %v685_v56, %v683_v55  ;;  %v890_v60 = vadd.f32 %v1743_v8, %v889_v57  ;;  %v686_v5 = vmax.f32 %v529_v0, 0.0 }
 0x1cc   :  { %v979_v61 = vadd.f32 %v978_v58, %v890_v60  ;;  %1017 = vmatmul.bf16.gmra.mxu0 %v727_v59 }
 0x1cd   :  { %v617_v62 = vpop.f32.mrf.mxu2 }
 0x1ce   :  { %1052 = vst [vmem:[#allocation5 + $0x20] sm:$0xff] %v979_v61  ;;  %v618_v9 = vadd.f32 %v617_v62, %v1689_v33 }
 0x1cf   :  { %v530_v2 = vpop.f32.mrf.mxu1 }
 0x1d0   :  { %v531_v3 = vadd.f32 %v530_v2, %v1684_v27  ;;  %v687_v15 = vmax.f32 %v618_v9, 0.0 }
 0x1d1   :  { %v891_v1 = vpop.f32.mrf.mxu3  ;;  %v980_v4 = vpop.f32.mrf.mxu0 }
 0x1d2   :  { %v688_v6 = vmax.f32 %v531_v3, 0.0  ;;  %v892_v7 = vadd.f32 %v1743_v8, %v891_v1 }
 0x1d4   :  { %v728_v10 = vpack.c.bf16 %v688_v6, %v686_v5  ;;  %v981_v11 = vadd.f32 %v980_v4, %v892_v7 }
 0x1d5   :  { %v619_v12 = vpop.f32.mrf.mxu2 }
 0x1d6   :  { %1053 = vst [vmem:[#allocation5 + $0x28] sm:$0xff] %v981_v11  ;;  %v620_v13 = vadd.f32 %v619_v12, %v1689_v33  ;;  %933 = vmatmul.bf16.gmra.mxu3 %v728_v10 }
 0x1d7   :  { %v533_v14 = vpop.f32.mrf.mxu1 }
 0x1d8   :  { %v689_v16 = vmax.f32 %v620_v13, 0.0  ;;  %v534_v17 = vadd.f32 %v533_v14, %v1684_v27 }
 0x1d9   :  { %v894_v18 = vpop.f32.mrf.mxu3  ;;  %v983_v19 = vpop.f32.mrf.mxu0 }
 0x1da   :  { %v729_v20 = vpack.c.bf16 %v689_v16, %v687_v15  ;;  %v895_v21 = vadd.f32 %v1743_v8, %v894_v18  ;;  %v690_v29 = vmax.f32 %v534_v17, 0.0 }
 0x1dc   :  { %v984_v22 = vadd.f32 %v983_v19, %v895_v21  ;;  %1022 = vmatmul.bf16.gmra.mxu0 %v729_v20 }
 0x1dd   :  { %v622_v24 = vpop.f32.mrf.mxu2 }
 0x1de   :  { %1054 = vst [vmem:[#allocation5 + $0x30] sm:$0xff] %v984_v22  ;;  %v623_v32 = vadd.f32 %v622_v24, %v1689_v33 }
 0x1df   :  { %v535_v23 = vpop.f32.mrf.mxu1 }
 0x1e0   :  { %v536_v25 = vadd.f32 %v535_v23, %v1684_v27  ;;  %v691_v39 = vmax.f32 %v623_v32, 0.0 }
 0x1e1   :  { %v896_v26 = vpop.f32.mrf.mxu3  ;;  %v985_v28 = vpop.f32.mrf.mxu0 }
 0x1e2   :  { %v692_v30 = vmax.f32 %v536_v25, 0.0  ;;  %v897_v31 = vadd.f32 %v1743_v8, %v896_v26 }
 0x1e4   :  { %v730_v34 = vpack.c.bf16 %v692_v30, %v690_v29  ;;  %v986_v35 = vadd.f32 %v985_v28, %v897_v31 }
 0x1e5   :  { %v624_v36 = vpop.f32.mrf.mxu2 }
 0x1e6   :  { %1055 = vst [vmem:[#allocation5 + $0x38] sm:$0xff] %v986_v35  ;;  %v625_v37 = vadd.f32 %v624_v36, %v1689_v33  ;;  %938 = vmatmul.bf16.gmra.mxu3 %v730_v34 }
 0x1e7   :  { %v538_v38 = vpop.f32.mrf.mxu1 }
 0x1e8   :  { %v693_v40 = vmax.f32 %v625_v37, 0.0  ;;  %v539_v63 = vadd.f32 %v538_v38, %v1684_v27 }
 0x1e9   :  { %v899_v41 = vpop.f32.mrf.mxu3  ;;  %v988_v42 = vpop.f32.mrf.mxu0 }
 0x1ea   :  { %v731_v43 = vpack.c.bf16 %v693_v40, %v691_v39  ;;  %v900_v44 = vadd.f32 %v1743_v8, %v899_v41  ;;  %v694_v51 = vmax.f32 %v539_v63, 0.0 }
 0x1ec   :  { %v989_v45 = vadd.f32 %v988_v42, %v900_v44  ;;  %1027 = vmatmul.bf16.gmra.mxu0 %v731_v43 }
 0x1ed   :  { %v627_v46 = vpop.f32.mrf.mxu2 }
 0x1ee   :  { %1056 = vst [vmem:[#allocation5 + $0x40] sm:$0xff] %v989_v45  ;;  %v628_v54 = vadd.f32 %v627_v46, %v1689_v33 }
 0x1ef   :  { %v540_v47 = vpop.f32.mrf.mxu1 }
 0x1f0   :  { %v541_v48 = vadd.f32 %v540_v47, %v1684_v27  ;;  %v695_v60 = vmax.f32 %v628_v54, 0.0 }
 0x1f1   :  { %v901_v49 = vpop.f32.mrf.mxu3  ;;  %v990_v50 = vpop.f32.mrf.mxu0 }
 0x1f2   :  { %v696_v52 = vmax.f32 %v541_v48, 0.0  ;;  %v902_v53 = vadd.f32 %v1743_v8, %v901_v49 }
 0x1f4   :  { %v732_v55 = vpack.c.bf16 %v696_v52, %v694_v51  ;;  %v991_v56 = vadd.f32 %v990_v50, %v902_v53 }
 0x1f5   :  { %v629_v57 = vpop.f32.mrf.mxu2 }
 0x1f6   :  { %1057 = vst [vmem:[#allocation5 + $0x48] sm:$0xff] %v991_v56  ;;  %v630_v58 = vadd.f32 %v629_v57, %v1689_v33  ;;  %943 = vmatmul.bf16.gmra.mxu3 %v732_v55 }
 0x1f7   :  { %v543_v59 = vpop.f32.mrf.mxu1 }
 0x1f8   :  { %v697_v61 = vmax.f32 %v630_v58, 0.0  ;;  %v544_v5 = vadd.f32 %v543_v59, %v1684_v27 }
 0x1f9   :  { %v904_v62 = vpop.f32.mrf.mxu3  ;;  %v993_v0 = vpop.f32.mrf.mxu0 }
 0x1fa   :  { %v733_v2 = vpack.c.bf16 %v697_v61, %v695_v60  ;;  %v905_v3 = vadd.f32 %v1743_v8, %v904_v62  ;;  %v698_v11 = vmax.f32 %v544_v5, 0.0 }
 0x1fc   :  { %v994_v1 = vadd.f32 %v993_v0, %v905_v3  ;;  %1032 = vmatmul.bf16.gmra.mxu0 %v733_v2 }
 0x1fd   :  { %v632_v4 = vpop.f32.mrf.mxu2 }
 0x1fe   :  { %1058 = vst [vmem:[#allocation5 + $0x50] sm:$0xff] %v994_v1  ;;  %v633_v14 = vadd.f32 %v632_v4, %v1689_v33 }
 0x1ff   :  { %v545_v6 = vpop.f32.mrf.mxu1 }
 0x200   :  { %v546_v7 = vadd.f32 %v545_v6, %v1684_v27  ;;  %v699_v21 = vmax.f32 %v633_v14, 0.0 }
 0x201   :  { %v906_v9 = vpop.f32.mrf.mxu3  ;;  %v995_v10 = vpop.f32.mrf.mxu0 }
 0x202   :  { %v700_v12 = vmax.f32 %v546_v7, 0.0  ;;  %v907_v13 = vadd.f32 %v1743_v8, %v906_v9 }
 0x204   :  { %v734_v15 = vpack.c.bf16 %v700_v12, %v698_v11  ;;  %v996_v16 = vadd.f32 %v995_v10, %v907_v13 }
 0x205   :  { %v634_v18 = vpop.f32.mrf.mxu2 }
 0x206   :  { %1059 = vst [vmem:[#allocation5 + $0x58] sm:$0xff] %v996_v16  ;;  %v635_v19 = vadd.f32 %v634_v18, %v1689_v33  ;;  %948 = vmatmul.bf16.gmra.mxu3 %v734_v15 }
 0x207   :  { %v548_v20 = vpop.f32.mrf.mxu1 }
 0x208   :  { %v701_v22 = vmax.f32 %v635_v19, 0.0  ;;  %v549_v29 = vadd.f32 %v548_v20, %v1684_v27 }
 0x209   :  { %v909_v24 = vpop.f32.mrf.mxu3  ;;  %v998_v17 = vpop.f32.mrf.mxu0 }
 0x20a   :  { %v735_v23 = vpack.c.bf16 %v701_v22, %v699_v21  ;;  %v910_v25 = vadd.f32 %v1743_v8, %v909_v24  ;;  %v702_v35 = vmax.f32 %v549_v29, 0.0 }
 0x20c   :  { %v999_v26 = vadd.f32 %v998_v17, %v910_v25  ;;  %1037 = vmatmul.bf16.gmra.mxu0 %v735_v23 }
 0x20d   :  { %v637_v28 = vpop.f32.mrf.mxu2 }
 0x20e   :  { %1060 = vst [vmem:[#allocation5 + $0x60] sm:$0xff] %v999_v26  ;;  %v638_v38 = vadd.f32 %v637_v28, %v1689_v33 }
 0x20f   :  { %v550_v30 = vpop.f32.mrf.mxu1 }
 0x210   :  { %v551_v31 = vadd.f32 %v550_v30, %v1684_v27  ;;  %v703_v43 = vmax.f32 %v638_v38, 0.0 }
 0x211   :  { %v911_v32 = vpop.f32.mrf.mxu3  ;;  %v1000_v34 = vpop.f32.mrf.mxu0 }
 0x212   :  { %v704_v36 = vmax.f32 %v551_v31, 0.0  ;;  %v912_v37 = vadd.f32 %v1743_v8, %v911_v32 }
 0x214   :  { %v736_v39 = vpack.c.bf16 %v704_v36, %v702_v35  ;;  %v1001_v40 = vadd.f32 %v1000_v34, %v912_v37 }
 0x215   :  { %v639_v41 = vpop.f32.mrf.mxu2 }
 0x216   :  { %1061 = vst [vmem:[#allocation5 + $0x68] sm:$0xff] %v1001_v40  ;;  %v640_v42 = vadd.f32 %v639_v41, %v1689_v33  ;;  %953 = vmatmul.bf16.gmra.mxu3 %v736_v39 }
 0x218   :  { %v705_v44 = vmax.f32 %v640_v42, 0.0 }
 0x219   :  { %v914_v45 = vpop.f32.mrf.mxu3  ;;  %v1003_v46 = vpop.f32.mrf.mxu0 }
 0x21a   :  { %v737_v27 = vpack.c.bf16 %v705_v44, %v703_v43  ;;  %v915_v63 = vadd.f32 %v1743_v8, %v914_v45 }
 0x21c   :  { %v1004_v47 = vadd.f32 %v1003_v46, %v915_v63  ;;  %1042 = vmatmul.bf16.vlgmr.msra.gmra.mxu2 %v737_v27 }
 0x21e   :  { %1062 = vst [vmem:[#allocation5 + $0x70] sm:$0xff] %v1004_v47 }
 0x221   :  { %v916_v48 = vpop.f32.mrf.mxu3  ;;  %v1005_v49 = vpop.f32.mrf.mxu0 }
 0x222   :  { %v917_v50 = vadd.f32 %v1743_v8, %v916_v48 }
 0x224   :  { %v1006_v51 = vadd.f32 %v1005_v49, %v917_v50 }
 0x226   :  { %1063 = vst [vmem:[#allocation5 + $0x78] sm:$0xff] %v1006_v51 }
 0x229   :  { %v919_v52 = vpop.f32.mrf.mxu3  ;;  %v1008_v53 = vpop.f32.mrf.mxu0 }
 0x22a   :  { %v920_v33 = vadd.f32 %v1743_v8, %v919_v52 }
 0x22c   :  { %v1009_v54 = vadd.f32 %v1008_v53, %v920_v33 }
 0x22e   :  { %1064 = vst [vmem:[#allocation5 + $0x80] sm:$0xff] %v1009_v54 }
 0x231   :  { %v921_v55 = vpop.f32.mrf.mxu3  ;;  %v1010_v56 = vpop.f32.mrf.mxu0 }
 0x232   :  { %v922_v57 = vadd.f32 %v1743_v8, %v921_v55 }
 0x234   :  { %v1011_v58 = vadd.f32 %v1010_v56, %v922_v57 }
 0x236   :  { %1065 = vst [vmem:[#allocation5 + $0x88] sm:$0xff] %v1011_v58 }
 0x239   :  { %v924_v59 = vpop.f32.mrf.mxu3  ;;  %v1013_v60 = vpop.f32.mrf.mxu0 }
 0x23a   :  { %v925_v61 = vadd.f32 %v1743_v8, %v924_v59 }
 0x23c   :  { %v1014_v62 = vadd.f32 %v1013_v60, %v925_v61 }
 0x23e   :  { %1066 = vst [vmem:[#allocation5 + $0x90] sm:$0xff] %v1014_v62 }
 0x241   :  { %v926_v0 = vpop.f32.mrf.mxu3  ;;  %v1015_v2 = vpop.f32.mrf.mxu0 }
 0x242   :  { %v927_v3 = vadd.f32 %v1743_v8, %v926_v0 }
 0x244   :  { %v1016_v1 = vadd.f32 %v1015_v2, %v927_v3 }
 0x246   :  { %1067 = vst [vmem:[#allocation5 + $0x98] sm:$0xff] %v1016_v1 }
 0x249   :  { %v929_v4 = vpop.f32.mrf.mxu3  ;;  %v1018_v5 = vpop.f32.mrf.mxu0 }
 0x24a   :  { %v930_v6 = vadd.f32 %v1743_v8, %v929_v4 }
 0x24c   :  { %v1019_v7 = vadd.f32 %v1018_v5, %v930_v6 }
 0x24e   :  { %1068 = vst [vmem:[#allocation5 + $0xa0] sm:$0xff] %v1019_v7 }
 0x251   :  { %v931_v9 = vpop.f32.mrf.mxu3  ;;  %v1020_v10 = vpop.f32.mrf.mxu0 }
 0x252   :  { %v932_v11 = vadd.f32 %v1743_v8, %v931_v9 }
 0x254   :  { %v1021_v12 = vadd.f32 %v1020_v10, %v932_v11 }
 0x256   :  { %1069 = vst [vmem:[#allocation5 + $0xa8] sm:$0xff] %v1021_v12 }
 0x259   :  { %v934_v13 = vpop.f32.mrf.mxu3  ;;  %v1023_v14 = vpop.f32.mrf.mxu0 }
 0x25a   :  { %v935_v15 = vadd.f32 %v1743_v8, %v934_v13 }
 0x25c   :  { %v1024_v16 = vadd.f32 %v1023_v14, %v935_v15 }
 0x25e   :  { %1070 = vst [vmem:[#allocation5 + $0xb0] sm:$0xff] %v1024_v16 }
 0x261   :  { %v936_v18 = vpop.f32.mrf.mxu3  ;;  %v1025_v19 = vpop.f32.mrf.mxu0 }
 0x262   :  { %v937_v20 = vadd.f32 %v1743_v8, %v936_v18 }
 0x264   :  { %v1026_v21 = vadd.f32 %v1025_v19, %v937_v20 }
 0x266   :  { %1071 = vst [vmem:[#allocation5 + $0xb8] sm:$0xff] %v1026_v21 }
 0x269   :  { %v939_v22 = vpop.f32.mrf.mxu3  ;;  %v1028_v24 = vpop.f32.mrf.mxu0 }
 0x26a   :  { %v940_v17 = vadd.f32 %v1743_v8, %v939_v22 }
 0x26c   :  { %v1029_v23 = vadd.f32 %v1028_v24, %v940_v17 }
 0x26e   :  { %1072 = vst [vmem:[#allocation5 + $0xc0] sm:$0xff] %v1029_v23 }
 0x271   :  { %v941_v25 = vpop.f32.mrf.mxu3  ;;  %v1030_v26 = vpop.f32.mrf.mxu0 }
 0x272   :  { %v942_v28 = vadd.f32 %v1743_v8, %v941_v25 }
 0x274   :  { %v1031_v29 = vadd.f32 %v1030_v26, %v942_v28 }
 0x276   :  { %1073 = vst [vmem:[#allocation5 + $0xc8] sm:$0xff] %v1031_v29 }
 0x279   :  { %v944_v30 = vpop.f32.mrf.mxu3  ;;  %v1033_v31 = vpop.f32.mrf.mxu0 }
 0x27a   :  { %v945_v32 = vadd.f32 %v1743_v8, %v944_v30 }
 0x27c   :  { %v1034_v34 = vadd.f32 %v1033_v31, %v945_v32 }
 0x27e   :  { %1074 = vst [vmem:[#allocation5 + $0xd0] sm:$0xff] %v1034_v34 }
 0x281   :  { %v946_v35 = vpop.f32.mrf.mxu3  ;;  %v1035_v36 = vpop.f32.mrf.mxu0 }
 0x282   :  { %v947_v37 = vadd.f32 %v1743_v8, %v946_v35 }
 0x284   :  { %v1036_v38 = vadd.f32 %v1035_v36, %v947_v37 }
 0x286   :  { %1075 = vst [vmem:[#allocation5 + $0xd8] sm:$0xff] %v1036_v38 }
 0x289   :  { %v949_v39 = vpop.f32.mrf.mxu3  ;;  %v1038_v40 = vpop.f32.mrf.mxu0 }
 0x28a   :  { %v950_v41 = vadd.f32 %v1743_v8, %v949_v39 }
 0x28c   :  { %v1039_v42 = vadd.f32 %v1038_v40, %v950_v41 }
 0x28e   :  { %1076 = vst [vmem:[#allocation5 + $0xe0] sm:$0xff] %v1039_v42 }
 0x291   :  { %v951_v43 = vpop.f32.mrf.mxu3  ;;  %v1040_v45 = vpop.f32.mrf.mxu0 }
 0x292   :  { %v952_v44 = vadd.f32 %v1743_v8, %v951_v43 }
 0x294   :  { %v1041_v46 = vadd.f32 %v1040_v45, %v952_v44 }
 0x296   :  { %1077 = vst [vmem:[#allocation5 + $0xe8] sm:$0xff] %v1041_v46 }
 0x299   :  { %v954_v27 = vpop.f32.mrf.mxu3 }
 0x29a   :  { %v955_v63 = vadd.f32 %v1743_v8, %v954_v27 }
 0x29f   :  { %v1043_v47 = vpop.f32.mrf.mxu2 }
 0x2a0   :  { %v1044_v48 = vadd.f32 %v1043_v47, %v955_v63 }
 0x2a1   :  { %v956_v49 = vpop.f32.mrf.mxu3 }
 0x2a2   :  { %1078 = vst [vmem:[#allocation5 + $0xf0] sm:$0xff] %v1044_v48  ;;  %v957_v50 = vadd.f32 %v1743_v8, %v956_v49 }
 0x2a7   :  { %v1045_v51 = vpop.f32.mrf.mxu2 }
 0x2a8   :  { %v1046_v52 = vadd.f32 %v1045_v51, %v957_v50 }
 0x2aa   :  { %1079 = vst [vmem:[#allocation5 + $0xf8] sm:$0xff] %v1046_v52 }
 0x2ab   :  { %1092 = dma.vmem_to_hbm [thread:$0]  %s1085_s10, 4096, %s1087_s12, [#allocation4], %s1443_s13, %s1443_s13, %s1444_s14  }
 0x2ac   :  { %1437 = dma.done.wait [#allocation4], 4096  }
 0x2ad   :  { %1438 = vsyncadd [#allocation4], 4294963200 }
 0x2ae   :  { %1097 = vsyncpa [#allocation3], 1 }
 0x2af   :  { %1098 = vsyncpa [#allocation4], 1 }

</bundles_post_ra>
